<compile_context>
chip_gen: v5e
topology: v5e:2x2
jax: 0.10.0
libtpu: 0.0.40
codegen_flags: <defaults>
</compile_context>

<pallas_src>
import jax
import jax.numpy as jnp
from jax.experimental import pallas as pl
from jax.experimental.pallas import tpu as pltpu


def _decoder_kernel(x_ref, h_ref,
                    wih_ref, whh_ref, bih_ref, bhh_ref,
                    wfc_ref, bfc_ref,
                    pred_ref, hnew_ref,
                    h_scr, hb_scr):
    """Grid axis = vocab tiles of fc_out. GRU cell computed once at step 0."""
    j = pl.program_id(0)
    H = h_ref.shape[1]
    EH = x_ref.shape[1]            # E + H  (x_ec = [emb | ctx])

    # ---- GRU cell (PyTorch gate order r, z, n); run once, keep result in scratch.
    @pl.when(j == 0)
    def _():
        x = x_ref[...]                            # [B, E+H]  bf16
        h_prev = h_ref[...]                       # [B, H]    f32

        # gi = [emb|ctx] @ W_ih^T + b_ih   (single fused K=E+H matmul)
        gi = (jnp.dot(x, wih_ref[...], preferred_element_type=jnp.float32)
              + bih_ref[...])                     # [B, 3H]
        gh = (jnp.dot(h_prev.astype(jnp.bfloat16), whh_ref[...],
                      preferred_element_type=jnp.float32)
              + bhh_ref[...])                     # [B, 3H]

        # r and z share one fused sigmoid over the contiguous [:, :2H] slab
        rz = jax.nn.sigmoid(gi[:, :2 * H] + gh[:, :2 * H])
        r = rz[:, :H]
        z = rz[:, H:]
        n = jnp.tanh(gi[:, 2 * H:] + r * gh[:, 2 * H:])
        h_new = (1.0 - z) * n + z * h_prev        # full-precision recurrence
        h_scr[...] = h_new
        hb_scr[...] = h_new.astype(jnp.bfloat16)  # bf16 copy reused by every fc tile

    # ---- fc_out on the current vocab tile:
    #   pred = [emb|ctx] @ W_ec + h_new @ W_h + b_fc
    # from ONE packed weight tile (static row slices of a VMEM ref are free).
    pred_ref[...] = (
        jnp.dot(x_ref[...], wfc_ref[:EH, :], preferred_element_type=jnp.float32)
        + jnp.dot(hb_scr[...], wfc_ref[EH:, :], preferred_element_type=jnp.float32)
        + bfc_ref[...])

    @pl.when(j == pl.num_programs(0) - 1)
    def _():
        hnew_ref[...] = h_scr[...]


def _pick_vocab_tile(output_dim, emb_dim, hid_dim, batch,
                     vmem_budget_bytes=24 * 1024 * 1024):
    """Largest vocab tile that divides O and keeps double-buffered tiles in budget."""
    k_fc = emb_dim + 2 * hid_dim
    for tn in (8192, 4096, 2048, 1024, 512, 256, 128):
        if output_dim % tn != 0:
            continue
        # double-buffered: bf16 packed-weight tile + f32 bias tile + f32 out tile
        per_tile = 2 * (k_fc * tn * 2 + tn * 4 + batch * tn * 4)
        if per_tile <= vmem_budget_bytes:
            return tn
    return output_dim  # small / odd vocab: single full-width tile


def prepare_decoder_params(params, emb_dim, hid_dim):
    """One-time prep: transpose, fuse/pack per kernel operand, cast weights to bf16."""
    E, H = emb_dim, hid_dim
    w_ih, w_hh, w_fc = params["w_ih"], params["w_hh"], params["w_fc"]
    # fc_out weight columns are ordered [emb | h | ctx]; repack rows as [emb | ctx | h]
    # so the kernel can slice one VMEM tile into the x_ec part and the h part.
    w_fc_pack = jnp.concatenate(
        [w_fc[:, :E], w_fc[:, E + H:], w_fc[:, E:E + H]], axis=1).T  # [E+2H, O]
    return {
        "embedding": params["embedding"].astype(jnp.bfloat16),        # [O, E]
        "w_ih_ec": w_ih.T.astype(jnp.bfloat16),                        # [E+H, 3H]
        "w_hh_t": w_hh.T.astype(jnp.bfloat16),                         # [H, 3H]
        "b_ih": params["b_ih"].reshape(1, -1).astype(jnp.float32),     # [1, 3H]
        "b_hh": params["b_hh"].reshape(1, -1).astype(jnp.float32),     # [1, 3H]
        "w_fc_pack": w_fc_pack.astype(jnp.bfloat16),                   # [E+2H, O]
        "b_fc": params["b_fc"].reshape(1, -1).astype(jnp.float32),     # [1, O]
    }


def decoder_forward(token_ids, hidden, context, prep):
    """token_ids: [B] int32; hidden/context: [1, B, H] f32.
    Returns (prediction [B, O] f32, hidden [1, B, H] f32)."""
    emb = prep["embedding"][token_ids]            # [B, E] bf16 (gather in plain JAX)
    ctx2d = context[0].astype(jnp.bfloat16)       # [B, H]
    h2d = hidden[0].astype(jnp.float32)           # [B, H] f32
    x_ec = jnp.concatenate([emb, ctx2d], axis=1)  # [B, E+H] bf16 (wrapper-side concat)

    B = x_ec.shape[0]
    H = h2d.shape[1]
    E = x_ec.shape[1] - H
    O = prep["w_fc_pack"].shape[1]
    TN = _pick_vocab_tile(O, E, H, B)
    nt = O // TN

    grid_spec = pltpu.PrefetchScalarGridSpec(
        num_scalar_prefetch=0,
        grid=(nt,),
        in_specs=[
            pl.BlockSpec((B, E + H), lambda j: (0, 0)),        # x_ec = [emb|ctx]
            pl.BlockSpec((B, H), lambda j: (0, 0)),            # h_prev
            pl.BlockSpec((E + H, 3 * H), lambda j: (0, 0)),    # w_ih_ec
            pl.BlockSpec((H, 3 * H), lambda j: (0, 0)),        # w_hh_t
            pl.BlockSpec((1, 3 * H), lambda j: (0, 0)),        # b_ih
            pl.BlockSpec((1, 3 * H), lambda j: (0, 0)),        # b_hh
            pl.BlockSpec((E + 2 * H, TN), lambda j: (0, j)),   # packed fc weight tile
            pl.BlockSpec((1, TN), lambda j: (0, j)),           # b_fc tile
        ],
        out_specs=(
            pl.BlockSpec((B, TN), lambda j: (0, j)),           # prediction tile
            pl.BlockSpec((B, H), lambda j: (0, 0)),            # new hidden
        ),
        scratch_shapes=[pltpu.VMEM((B, H), jnp.float32),       # h_new (f32)
                        pltpu.VMEM((B, H), jnp.bfloat16)],     # h_new (bf16, fc reuse)
    )

    pred, h_new = pl.pallas_call(
        _decoder_kernel,
        out_shape=(jax.ShapeDtypeStruct((B, O), jnp.float32),
                   jax.ShapeDtypeStruct((B, H), jnp.float32)),
        grid_spec=grid_spec,
        compiler_params=pltpu.CompilerParams(
            dimension_semantics=("arbitrary",),
            vmem_limit_bytes=32 * 1024 * 1024),
    )(x_ec, h2d,
      prep["w_ih_ec"], prep["w_hh_t"], prep["b_ih"], prep["b_hh"],
      prep["w_fc_pack"], prep["b_fc"])

    return pred, h_new[None, :, :]


def _reference_forward(token_ids, hidden, context, params):
    """Pure-JAX fp32 reference replicating PyTorch semantics (eval mode)."""
    emb = params["embedding"][token_ids]
    ctx = context[0]
    h = hidden[0]
    H = h.shape[1]
    x = jnp.concatenate([emb, ctx], axis=1)
    gi = x @ params["w_ih"].T + params["b_ih"]
    gh = h @ params["w_hh"].T + params["b_hh"]
    r = jax.nn.sigmoid(gi[:, :H] + gh[:, :H])
    z = jax.nn.sigmoid(gi[:, H:2 * H] + gh[:, H:2 * H])
    n = jnp.tanh(gi[:, 2 * H:] + r * gh[:, 2 * H:])
    h_new = (1.0 - z) * n + z * h
    out = jnp.concatenate([emb, h_new, ctx], axis=1)
    pred = out @ params["w_fc"].T + params["b_fc"]
    return pred, h_new[None]


def init_params(key, output_dim, emb_dim, hid_dim):
    ks = jax.random.split(key, 7)
    s_gru = 1.0 / jnp.sqrt(hid_dim)
    s_fc = 1.0 / jnp.sqrt(emb_dim + 2 * hid_dim)
    return {
        "embedding": jax.random.normal(ks[0], (output_dim, emb_dim), jnp.float32),
        "w_ih": jax.random.uniform(ks[1], (3 * hid_dim, emb_dim + hid_dim),
                                   jnp.float32, -s_gru, s_gru),
        "w_hh": jax.random.uniform(ks[2], (3 * hid_dim, hid_dim),
                                   jnp.float32, -s_gru, s_gru),
        "b_ih": jax.random.uniform(ks[3], (3 * hid_dim,), jnp.float32, -s_gru, s_gru),
        "b_hh": jax.random.uniform(ks[4], (3 * hid_dim,), jnp.float32, -s_gru, s_gru),
        "w_fc": jax.random.uniform(ks[5], (output_dim, emb_dim + 2 * hid_dim),
                                   jnp.float32, -s_fc, s_fc),
        "b_fc": jax.random.uniform(ks[6], (output_dim,), jnp.float32, -s_fc, s_fc),
    }


if __name__ == "__main__":
    OUTPUT_DIM = 256   # vocab size
    EMB_DIM = 128
    HID_DIM = 128
    BATCH = 8

    key = jax.random.PRNGKey(0)
    k_par, k_tok, k_hid, k_ctx = jax.random.split(key, 4)

    params = init_params(k_par, OUTPUT_DIM, EMB_DIM, HID_DIM)
    prep = prepare_decoder_params(params, EMB_DIM, HID_DIM)   # one-time weight prep

    token_ids = jax.random.randint(k_tok, (BATCH,), 0, OUTPUT_DIM, dtype=jnp.int32)
    hidden = jax.random.normal(k_hid, (1, BATCH, HID_DIM), jnp.float32)
    context = jax.random.normal(k_ctx, (1, BATCH, HID_DIM), jnp.float32)

    fwd = jax.jit(decoder_forward)
    pred, h_new = fwd(token_ids, hidden, context, prep)
    jax.block_until_ready((pred, h_new))

    pred_ref, h_ref = _reference_forward(token_ids, hidden, context, params)
    assert pred.shape == (BATCH, OUTPUT_DIM)
    assert h_new.shape == (1, BATCH, HID_DIM)
    # bf16 weight storage -> compare against fp32 reference with bf16-level tolerance
    assert jnp.allclose(pred, pred_ref, atol=2e-2, rtol=2e-2)
    assert jnp.allclose(h_new, h_ref, atol=2e-2, rtol=2e-2)

    print("KERNEL_OK")
</pallas_src>

<mosaic_0001>
module attributes {stable_mosaic.version = 11 : i64} {
  func.func @_decoder_kernel(%arg0: i32, %arg1: memref<8x256xbf16, #tpu.memory_space<vmem>>, %arg2: memref<8x128xf32, #tpu.memory_space<vmem>>, %arg3: memref<256x384xbf16, #tpu.memory_space<vmem>>, %arg4: memref<128x384xbf16, #tpu.memory_space<vmem>>, %arg5: memref<1x384xf32, #tpu.memory_space<vmem>>, %arg6: memref<1x384xf32, #tpu.memory_space<vmem>>, %arg7: memref<384x256xbf16, #tpu.memory_space<vmem>>, %arg8: memref<1x256xf32, #tpu.memory_space<vmem>>, %arg9: memref<8x256xf32, #tpu.memory_space<vmem>>, %arg10: memref<8x128xf32, #tpu.memory_space<vmem>>, %arg11: memref<8x128xf32, #tpu.memory_space<vmem>>, %arg12: memref<8x128xbf16, #tpu.memory_space<vmem>>) attributes {dimension_semantics = [#tpu.dimension_semantics<arbitrary>], iteration_bounds = array<i64: 1>, scalar_prefetch = 0 : i64, scratch_operands = 2 : i64, tpu.core_type = #tpu.core_type<tc>, window_params = [{pipeline_mode = #tpu.pipeline_mode<synchronous>, transform_indices = @transform_0, window_bounds = array<i64: 8, 256>}, {pipeline_mode = #tpu.pipeline_mode<synchronous>, transform_indices = @transform_1, window_bounds = array<i64: 8, 128>}, {pipeline_mode = #tpu.pipeline_mode<synchronous>, transform_indices = @transform_2, window_bounds = array<i64: 256, 384>}, {pipeline_mode = #tpu.pipeline_mode<synchronous>, transform_indices = @transform_3, window_bounds = array<i64: 128, 384>}, {pipeline_mode = #tpu.pipeline_mode<synchronous>, transform_indices = @transform_4, window_bounds = array<i64: 1, 384>}, {pipeline_mode = #tpu.pipeline_mode<synchronous>, transform_indices = @transform_5, window_bounds = array<i64: 1, 384>}, {transform_indices = @transform_6, window_bounds = array<i64: 384, 256>}, {transform_indices = @transform_7, window_bounds = array<i64: 1, 256>}, {transform_indices = @transform_8, window_bounds = array<i64: 8, 256>}, {pipeline_mode = #tpu.pipeline_mode<synchronous>, transform_indices = @transform_9, window_bounds = array<i64: 8, 128>}]} {
    %c0_i32 = arith.constant 0 : i32
    %0 = arith.cmpi eq, %arg0, %c0_i32 : i32
    %1 = arith.extui %0 : i1 to i32
    %c0_i32_0 = arith.constant 0 : i32
    %2 = arith.cmpi ne, %1, %c0_i32_0 : i32
    scf.if %2 {
      %c0_14 = arith.constant 0 : index
      %c0_15 = arith.constant 0 : index
      %17 = vector.load %arg1[%c0_14, %c0_15] : memref<8x256xbf16, #tpu.memory_space<vmem>>, vector<8x256xbf16>
      %c0_16 = arith.constant 0 : index
      %c0_17 = arith.constant 0 : index
      %18 = vector.load %arg2[%c0_16, %c0_17] : memref<8x128xf32, #tpu.memory_space<vmem>>, vector<8x128xf32>
      %c0_18 = arith.constant 0 : index
      %c0_19 = arith.constant 0 : index
      %19 = vector.load %arg3[%c0_18, %c0_19] : memref<256x384xbf16, #tpu.memory_space<vmem>>, vector<256x384xbf16>
      %cst_20 = arith.constant dense<0.000000e+00> : vector<8x384xf32>
      %20 = tpu.matmul %17, %19, %cst_20 {dimension_numbers = #tpu.dot_dimension_numbers<[1], [0], [0], [1], [0, 0, 1, 1], [], []>} : vector<8x256xbf16>, vector<256x384xbf16>, vector<8x384xf32> -> vector<8x384xf32>
      %c0_21 = arith.constant 0 : index
      %c0_22 = arith.constant 0 : index
      %21 = vector.load %arg5[%c0_21, %c0_22] : memref<1x384xf32, #tpu.memory_space<vmem>>, vector<1x384xf32>
      %22 = vector.broadcast %21 : vector<1x384xf32> to vector<8x384xf32>
      %23 = arith.addf %20, %22 : vector<8x384xf32>
      %24 = arith.truncf %18 : vector<8x128xf32> to vector<8x128xbf16>
      %c0_23 = arith.constant 0 : index
      %c0_24 = arith.constant 0 : index
      %25 = vector.load %arg4[%c0_23, %c0_24] : memref<128x384xbf16, #tpu.memory_space<vmem>>, vector<128x384xbf16>
      %cst_25 = arith.constant dense<0.000000e+00> : vector<8x384xf32>
      %26 = tpu.matmul %24, %25, %cst_25 {dimension_numbers = #tpu.dot_dimension_numbers<[1], [0], [0], [1], [0, 0, 1, 1], [], []>} : vector<8x128xbf16>, vector<128x384xbf16>, vector<8x384xf32> -> vector<8x384xf32>
      %c0_26 = arith.constant 0 : index
      %c0_27 = arith.constant 0 : index
      %27 = vector.load %arg6[%c0_26, %c0_27] : memref<1x384xf32, #tpu.memory_space<vmem>>, vector<1x384xf32>
      %28 = vector.broadcast %27 : vector<1x384xf32> to vector<8x384xf32>
      %29 = arith.addf %26, %28 : vector<8x384xf32>
      %30 = vector.extract_strided_slice %23 {offsets = [0, 0], sizes = [8, 256], strides = [1, 1]} : vector<8x384xf32> to vector<8x256xf32>
      %31 = vector.extract_strided_slice %29 {offsets = [0, 0], sizes = [8, 256], strides = [1, 1]} : vector<8x384xf32> to vector<8x256xf32>
      %32 = arith.addf %30, %31 : vector<8x256xf32>
      %33 = arith.negf %32 : vector<8x256xf32>
      %34 = math.exp %33 : vector<8x256xf32>
      %cst_28 = arith.constant 1.000000e+00 : f32
      %35 = vector.broadcast %cst_28 : f32 to vector<8x256xf32>
      %36 = arith.addf %35, %34 : vector<8x256xf32>
      %37 = arith.divf %35, %36 : vector<8x256xf32>
      %38 = vector.extract_strided_slice %37 {offsets = [0, 0], sizes = [8, 128], strides = [1, 1]} : vector<8x256xf32> to vector<8x128xf32>
      %39 = vector.extract_strided_slice %37 {offsets = [0, 128], sizes = [8, 128], strides = [1, 1]} : vector<8x256xf32> to vector<8x128xf32>
      %40 = vector.extract_strided_slice %23 {offsets = [0, 256], sizes = [8, 128], strides = [1, 1]} : vector<8x384xf32> to vector<8x128xf32>
      %41 = vector.extract_strided_slice %29 {offsets = [0, 256], sizes = [8, 128], strides = [1, 1]} : vector<8x384xf32> to vector<8x128xf32>
      %42 = arith.mulf %38, %41 : vector<8x128xf32>
      %43 = arith.addf %40, %42 : vector<8x128xf32>
      %44 = math.tanh %43 : vector<8x128xf32>
      %cst_29 = arith.constant 1.000000e+00 : f32
      %45 = vector.broadcast %cst_29 : f32 to vector<8x128xf32>
      %46 = arith.subf %45, %39 : vector<8x128xf32>
      %47 = arith.mulf %46, %44 : vector<8x128xf32>
      %48 = arith.mulf %39, %18 : vector<8x128xf32>
      %49 = arith.addf %47, %48 : vector<8x128xf32>
      %c0_30 = arith.constant 0 : index
      %c0_31 = arith.constant 0 : index
      %50 = vector.load %arg11[%c0_30, %c0_31] : memref<8x128xf32, #tpu.memory_space<vmem>>, vector<8x128xf32>
      tpu.vector_store %arg11[%c0_30, %c0_31], %49 {strides = array<i32>} : memref<8x128xf32, #tpu.memory_space<vmem>>, vector<8x128xf32>,
      %51 = arith.truncf %49 : vector<8x128xf32> to vector<8x128xbf16>
      %c0_32 = arith.constant 0 : index
      %c0_33 = arith.constant 0 : index
      %52 = vector.load %arg12[%c0_32, %c0_33] : memref<8x128xbf16, #tpu.memory_space<vmem>>, vector<8x128xbf16>
      tpu.vector_store %arg12[%c0_32, %c0_33], %51 {strides = array<i32>} : memref<8x128xbf16, #tpu.memory_space<vmem>>, vector<8x128xbf16>,
    } else {
    }
    %c0 = arith.constant 0 : index
    %c0_1 = arith.constant 0 : index
    %3 = vector.load %arg1[%c0, %c0_1] : memref<8x256xbf16, #tpu.memory_space<vmem>>, vector<8x256xbf16>
    %c0_2 = arith.constant 0 : index
    %c0_3 = arith.constant 0 : index
    %4 = vector.load %arg7[%c0_2, %c0_3] : memref<384x256xbf16, #tpu.memory_space<vmem>>, vector<256x256xbf16>
    %cst = arith.constant dense<0.000000e+00> : vector<8x256xf32>
    %5 = tpu.matmul %3, %4, %cst {dimension_numbers = #tpu.dot_dimension_numbers<[1], [0], [0], [1], [0, 0, 1, 1], [], []>} : vector<8x256xbf16>, vector<256x256xbf16>, vector<8x256xf32> -> vector<8x256xf32>
    %c0_4 = arith.constant 0 : index
    %c0_5 = arith.constant 0 : index
    %6 = vector.load %arg12[%c0_4, %c0_5] : memref<8x128xbf16, #tpu.memory_space<vmem>>, vector<8x128xbf16>
    %c256 = arith.constant 256 : index
    %c0_6 = arith.constant 0 : index
    %7 = vector.load %arg7[%c256, %c0_6] : memref<384x256xbf16, #tpu.memory_space<vmem>>, vector<128x256xbf16>
    %cst_7 = arith.constant dense<0.000000e+00> : vector<8x256xf32>
    %8 = tpu.matmul %6, %7, %cst_7 {dimension_numbers = #tpu.dot_dimension_numbers<[1], [0], [0], [1], [0, 0, 1, 1], [], []>} : vector<8x128xbf16>, vector<128x256xbf16>, vector<8x256xf32> -> vector<8x256xf32>
    %9 = arith.addf %5, %8 : vector<8x256xf32>
    %c0_8 = arith.constant 0 : index
    %c0_9 = arith.constant 0 : index
    %10 = vector.load %arg8[%c0_8, %c0_9] : memref<1x256xf32, #tpu.memory_space<vmem>>, vector<1x256xf32>
    %11 = vector.broadcast %10 : vector<1x256xf32> to vector<8x256xf32>
    %12 = arith.addf %9, %11 : vector<8x256xf32>
    %c0_10 = arith.constant 0 : index
    %c0_11 = arith.constant 0 : index
    %13 = vector.load %arg9[%c0_10, %c0_11] : memref<8x256xf32, #tpu.memory_space<vmem>>, vector<8x256xf32>
    tpu.vector_store %arg9[%c0_10, %c0_11], %12 {strides = array<i32>} : memref<8x256xf32, #tpu.memory_space<vmem>>, vector<8x256xf32>,
    %c0_i32_12 = arith.constant 0 : i32
    %14 = arith.cmpi eq, %arg0, %c0_i32_12 : i32
    %15 = arith.extui %14 : i1 to i32
    %c0_i32_13 = arith.constant 0 : i32
    %16 = arith.cmpi ne, %15, %c0_i32_13 : i32
    scf.if %16 {
      %c0_14 = arith.constant 0 : index
      %c0_15 = arith.constant 0 : index
      %17 = vector.load %arg11[%c0_14, %c0_15] : memref<8x128xf32, #tpu.memory_space<vmem>>, vector<8x128xf32>
      %c0_16 = arith.constant 0 : index
      %c0_17 = arith.constant 0 : index
      %18 = vector.load %arg10[%c0_16, %c0_17] : memref<8x128xf32, #tpu.memory_space<vmem>>, vector<8x128xf32>
      tpu.vector_store %arg10[%c0_16, %c0_17], %17 {strides = array<i32>} : memref<8x128xf32, #tpu.memory_space<vmem>>, vector<8x128xf32>,
    } else {
    }
    return
  }
  func.func @transform_0(%arg0: i32) -> (i32, i32) {
    %c0_i32 = arith.constant 0 : i32
    %c0_i32_0 = arith.constant 0 : i32
    %c0_i32_1 = arith.constant 0 : i32
    return %c0_i32, %c0_i32_0 : i32, i32
  }
  func.func @transform_1(%arg0: i32) -> (i32, i32) {
    %c0_i32 = arith.constant 0 : i32
    %c0_i32_0 = arith.constant 0 : i32
    %c0_i32_1 = arith.constant 0 : i32
    return %c0_i32, %c0_i32_0 : i32, i32
  }
  func.func @transform_2(%arg0: i32) -> (i32, i32) {
    %c0_i32 = arith.constant 0 : i32
    %c0_i32_0 = arith.constant 0 : i32
    %c0_i32_1 = arith.constant 0 : i32
    return %c0_i32, %c0_i32_0 : i32, i32
  }
  func.func @transform_3(%arg0: i32) -> (i32, i32) {
    %c0_i32 = arith.constant 0 : i32
    %c0_i32_0 = arith.constant 0 : i32
    %c0_i32_1 = arith.constant 0 : i32
    return %c0_i32, %c0_i32_0 : i32, i32
  }
  func.func @transform_4(%arg0: i32) -> (i32, i32) {
    %c0_i32 = arith.constant 0 : i32
    %c0_i32_0 = arith.constant 0 : i32
    %c0_i32_1 = arith.constant 0 : i32
    return %c0_i32, %c0_i32_0 : i32, i32
  }
  func.func @transform_5(%arg0: i32) -> (i32, i32) {
    %c0_i32 = arith.constant 0 : i32
    %c0_i32_0 = arith.constant 0 : i32
    %c0_i32_1 = arith.constant 0 : i32
    return %c0_i32, %c0_i32_0 : i32, i32
  }
  func.func @transform_6(%arg0: i32) -> (i32, i32) {
    %c0_i32 = arith.constant 0 : i32
    %c0_i32_0 = arith.constant 0 : i32
    return %c0_i32, %arg0 : i32, i32
  }
  func.func @transform_7(%arg0: i32) -> (i32, i32) {
    %c0_i32 = arith.constant 0 : i32
    %c0_i32_0 = arith.constant 0 : i32
    return %c0_i32, %arg0 : i32, i32
  }
  func.func @transform_8(%arg0: i32) -> (i32, i32) {
    %c0_i32 = arith.constant 0 : i32
    %c0_i32_0 = arith.constant 0 : i32
    return %c0_i32, %arg0 : i32, i32
  }
  func.func @transform_9(%arg0: i32) -> (i32, i32) {
    %c0_i32 = arith.constant 0 : i32
    %c0_i32_0 = arith.constant 0 : i32
    %c0_i32_1 = arith.constant 0 : i32
    return %c0_i32, %c0_i32_0 : i32, i32
  }
}

</mosaic_0001>

<bundles_post_ra>
// kernel: decoder_forward.1
= control target key start
LH: loop header
LB: loop body
LE: loop exit
PB: predicated region body
PF: predicated region fallthrough
CT: control target
= control target key end

     0   :  { %15 = vsyncpa [#allocation5], 0  ;;  %s2084_s0 = inlined_call_operand.vmem [shape: bf16[8,256], index: 0, kind: input, shape index: {}]   ;;  %s2085_s1 = inlined_call_operand.vmem [shape: f32[8,128], index: 1, kind: input, shape index: {}]   ;;  %s2086_s2 = inlined_call_operand.hbm [shape: bf16[256,384], index: 2, kind: input, shape index: {}]   ;;  %s2087_s3 = inlined_call_operand.hbm [shape: bf16[128,384], index: 3, kind: input, shape index: {}]   ;;  %s2088_s4 = inlined_call_operand.vmem [shape: f32[1,384], index: 4, kind: input, shape index: {}]   ;;  %s2089_s5 = inlined_call_operand.vmem [shape: f32[1,384], index: 5, kind: input, shape index: {}]   ;;  %s2090_s6 = inlined_call_operand.hbm [shape: bf16[384,256], index: 6, kind: input, shape index: {}]   ;;  %s2091_s7 = inlined_call_operand.vmem [shape: f32[1,256], index: 7, kind: input, shape index: {}]   ;;  %s2092_s8 = inlined_call_operand.hbm [shape: f32[8,256], index: 8, kind: output, shape index: {0}]   ;;  %s2093_s9 = inlined_call_operand.hbm [shape: f32[8,128], index: 9, kind: output, shape index: {1}]  }
   0x1   :  { %16 = vsyncpa [#allocation8], 0 }
   0x2   :  { %17 = vsyncpa [#allocation6], 0 }
   0x3   :  { %18 = vsyncpa [#allocation12], 0  ;;  %s40_s11 = sshll.u32 %s2087_s3, 4  ;;  %s1930_s12 = smov [#allocation7]   ;;  %s41_s11 = int_to_ptr.hbm [resolvable:$true] %s40_s11 }
   0x4   :  { %s42_s13 = sshll.u32 %s1930_s12, 4  ;;  %s27_s16 = sshll.u32 %s2086_s2, 4  ;;  %s43_s13 = int_to_ptr.vmem [resolvable:$true] %s42_s13  ;;  %s28_s16 = int_to_ptr.hbm [resolvable:$true] %s27_s16 }
   0x5   :  { %s1931_s17 = smov 192   ;;  %s1932_s18 = smov 12  }
   0x6   :  { %48 = dma.hbm_to_vmem [thread:$0]  %s41_s11, 3072, %s43_s13, [#allocation8], %s1931_s17, %s1931_s17, %s1932_s18  }
   0x7   :  { %s1933_s19 = smov [#allocation4]   ;;  %s57_s23 = sshll.u32 %s2090_s6, 4  ;;  %s58_s23 = int_to_ptr.hbm [resolvable:$true] %s57_s23 }
   0x8   :  { %s29_s20 = sshll.u32 %s1933_s19, 4  ;;  %s1934_s3 = smov [#allocation9]   ;;  %s30_s20 = int_to_ptr.vmem [resolvable:$true] %s29_s20 }
   0x9   :  { %35 = dma.hbm_to_vmem [thread:$0]  %s28_s16, 6144, %s30_s20, [#allocation5], %s1931_s17, %s1931_s17, %s1932_s18  }
   0xa   :  { %s59_s24 = sshll.u32 %s1934_s3, 4  ;;  %s1935_s25 = smov 128   ;;  %s60_s24 = int_to_ptr.vmem [resolvable:$true] %s59_s24 }
   0xb   :  { %s1936_s26 = smov 8  }
   0xc   :  { %65 = dma.hbm_to_vmem [thread:$0]  %s58_s23, 6144, %s60_s24, [#allocation8], %s1935_s25, %s1935_s25, %s1936_s26  }
   0xd   :  { %1922 = dma.done.wait [#allocation5], 6144  }
   0xe   :  { %1923 = vsyncadd [#allocation5], 4294961152 }
   0xf   :  { %1924 = dma.done.wait [#allocation8], 9216  }
  0x10   :  { %1925 = vsyncadd [#allocation8], 4294958080  ;;  %v1267_v0 = vld [vmem:[#allocation4 + $0xa8] sm:$0xf]  ;;  %v1685_v1 = vld [vmem:[#allocation4 + $0xb0] sm:$0xf0] }
  0x11   :  { %v1684_v2 = vld [vmem:[#allocation4 + $0xac] sm:$0xf]  ;;  %v1268_v3 = vor.u32 %v1685_v1, %v1267_v0  ;;  %v1269_v4 = vld [vmem:[#allocation4 + $0xb4] sm:$0xf0]  ;;  %v1255_v9 = vld [vmem:[#allocation4 + $0x90] sm:$0xf] }
  0x12   :  { %v1708_v5 = vld [vmem:[#allocation4 + $0x16c] sm:$0xf]  ;;  %v1365_v6 = vld [vmem:[#allocation4 + $0x174] sm:$0xf0]  ;;  %v1272_v7 = vor.u32 %v1684_v2, %v1269_v4  ;;  %v1682_v10 = vld [vmem:[#allocation4 + $0x98] sm:$0xf0] }
  0x13   :  { %v1368_v8 = vor.u32 %v1708_v5, %v1365_v6  ;;  %v1681_v11 = vld [vmem:[#allocation4 + $0x94] sm:$0xf]  ;;  %421 = vmatpush.bf16.msra.mxu0 %v1268_v3  ;;  %v1256_v12 = vor.u32 %v1682_v10, %v1255_v9  ;;  %v1257_v13 = vld [vmem:[#allocation4 + $0x9c] sm:$0xf0]  ;;  %v1243_v18 = vld [vmem:[#allocation4 + $0x78] sm:$0xf] }
  0x14   :  { %v1705_v14 = vld [vmem:[#allocation4 + $0x154] sm:$0xf]  ;;  %v1353_v15 = vld [vmem:[#allocation4 + $0x15c] sm:$0xf0]  ;;  %447 = vmatpush.bf16.msra.mxu2 %v1272_v7  ;;  %v1260_v16 = vor.u32 %v1681_v11, %v1257_v13  ;;  %v1679_v19 = vld [vmem:[#allocation4 + $0x80] sm:$0xf0] }
  0x15   :  { %460 = vmatpush.bf16.msra.mxu3 %v1368_v8  ;;  %v1356_v17 = vor.u32 %v1705_v14, %v1353_v15  ;;  %v1678_v20 = vld [vmem:[#allocation4 + $0x7c] sm:$0xf]  ;;  %v1245_v21 = vld [vmem:[#allocation4 + $0x84] sm:$0xf0]  ;;  %v1244_v24 = vor.u32 %v1679_v19, %v1243_v18  ;;  %v1231_v27 = vld [vmem:[#allocation4 + $0x60] sm:$0xf] }
  0x16   :  { %v1702_v22 = vld [vmem:[#allocation4 + $0x13c] sm:$0xf]  ;;  %v1341_v23 = vld [vmem:[#allocation4 + $0x144] sm:$0xf0]  ;;  %v1248_v25 = vor.u32 %v1678_v20, %v1245_v21  ;;  %v1676_v28 = vld [vmem:[#allocation4 + $0x68] sm:$0xf0] }
  0x17   :  { %422 = vmatpush.bf16.msra.mxu0 %v1256_v12  ;;  %v1344_v26 = vor.u32 %v1702_v22, %v1341_v23  ;;  %v1675_v29 = vld [vmem:[#allocation4 + $0x64] sm:$0xf]  ;;  %v1233_v30 = vld [vmem:[#allocation4 + $0x6c] sm:$0xf0]  ;;  %v1232_v33 = vor.u32 %v1676_v28, %v1231_v27  ;;  %v1219_v34 = vld [vmem:[#allocation4 + $0x48] sm:$0xf] }
  0x18   :  { %448 = vmatpush.bf16.msra.mxu2 %v1260_v16  ;;  %v1699_v31 = vld [vmem:[#allocation4 + $0x124] sm:$0xf]  ;;  %v1329_v32 = vld [vmem:[#allocation4 + $0x12c] sm:$0xf0]  ;;  %v1673_v35 = vld [vmem:[#allocation4 + $0x50] sm:$0xf0]  ;;  %v1236_v36 = vor.u32 %v1675_v29, %v1233_v30 }
  0x19   :  { %461 = vmatpush.bf16.msra.mxu3 %v1356_v17  ;;  %v1332_v37 = vor.u32 %v1699_v31, %v1329_v32  ;;  %v1672_v38 = vld [vmem:[#allocation4 + $0x4c] sm:$0xf]  ;;  %v1363_v39 = vld [vmem:[#allocation4 + $0x168] sm:$0xf]  ;;  %v1709_v40 = vld [vmem:[#allocation4 + $0x170] sm:$0xf0]  ;;  %v1220_v46 = vor.u32 %v1673_v35, %v1219_v34 }
  0x1a   :  { %v1221_v41 = vld [vmem:[#allocation4 + $0x54] sm:$0xf0]  ;;  %v1696_v42 = vld [vmem:[#allocation4 + $0x10c] sm:$0xf]  ;;  %v1364_v44 = vor.u32 %v1709_v40, %v1363_v39  ;;  %v1351_v45 = vld [vmem:[#allocation4 + $0x150] sm:$0xf] }
  0x1b   :  { %423 = vmatpush.bf16.msra.mxu0 %v1244_v24  ;;  %v1317_v43 = vld [vmem:[#allocation4 + $0x114] sm:$0xf0]  ;;  %v1706_v47 = vld [vmem:[#allocation4 + $0x158] sm:$0xf0]  ;;  %v1224_v48 = vor.u32 %v1672_v38, %v1221_v41  ;;  %v1207_v50 = vld [vmem:[#allocation4 + $0x30] sm:$0xf] }
  0x1c   :  { %449 = vmatpush.bf16.msra.mxu2 %v1248_v25  ;;  %434 = vmatpush.bf16.msra.mxu1 %v1364_v44  ;;  %v1320_v49 = vor.u32 %v1696_v42, %v1317_v43  ;;  %v1670_v51 = vld [vmem:[#allocation4 + $0x38] sm:$0xf0]  ;;  %v1669_v52 = vld [vmem:[#allocation4 + $0x34] sm:$0xf]  ;;  %v1352_v53 = vor.u32 %v1706_v47, %v1351_v45  ;;  %v1209_v54 = vld [vmem:[#allocation4 + $0x3c] sm:$0xf0] }
  0x1d   :  { %462 = vmatpush.bf16.msra.mxu3 %v1344_v26  ;;  %v1693_v55 = vld [vmem:[#allocation4 + $0xf4] sm:$0xf]  ;;  %v1305_v56 = vld [vmem:[#allocation4 + $0xfc] sm:$0xf0]  ;;  %v1208_v57 = vor.u32 %v1670_v51, %v1207_v50  ;;  %v1339_v58 = vld [vmem:[#allocation4 + $0x138] sm:$0xf]  ;;  %v1212_v60 = vor.u32 %v1669_v52, %v1209_v54 }
  0x1e   :  { %v1703_v59 = vld [vmem:[#allocation4 + $0x140] sm:$0xf0]  ;;  %v1308_v61 = vor.u32 %v1693_v55, %v1305_v56  ;;  %v1195_v62 = vld [vmem:[#allocation4 + $0x18] sm:$0xf]  ;;  %v1666_v0 = vld [vmem:[#allocation4 + $0x1c] sm:$0xf] }
  0x1f   :  { %424 = vmatpush.bf16.msra.mxu0 %v1232_v33  ;;  %v1667_v63 = vld [vmem:[#allocation4 + $0x20] sm:$0xf0]  ;;  %v1340_v1 = vor.u32 %v1703_v59, %v1339_v58  ;;  %v1197_v2 = vld [vmem:[#allocation4 + $0x24] sm:$0xf0]  ;;  %v1690_v3 = vld [vmem:[#allocation4 + $0xdc] sm:$0xf] }
  0x20   :  { %450 = vmatpush.bf16.msra.mxu2 %v1236_v36  ;;  %435 = vmatpush.bf16.msra.mxu1 %v1352_v53  ;;  %v1293_v4 = vld [vmem:[#allocation4 + $0xe4] sm:$0xf0]  ;;  %v1183_v5 = vld [vmem:[#allocation4] sm:$0xf]  ;;  %v1700_v7 = vld [vmem:[#allocation4 + $0x128] sm:$0xf0]  ;;  %v1196_v8 = vor.u32 %v1667_v63, %v1195_v62  ;;  %v1200_v13 = vor.u32 %v1666_v0, %v1197_v2 }
  0x21   :  { %463 = vmatpush.bf16.msra.mxu3 %v1332_v37  ;;  %v1327_v6 = vld [vmem:[#allocation4 + $0x120] sm:$0xf]  ;;  %v1664_v9 = vld [vmem:[#allocation4 + $0x8] sm:$0xf0]  ;;  %v1663_v10 = vld [vmem:[#allocation4 + $0x4] sm:$0xf]  ;;  %v1296_v14 = vor.u32 %v1690_v3, %v1293_v4 }
  0x22   :  { %v1185_v11 = vld [vmem:[#allocation4 + $0xc] sm:$0xf0]  ;;  %v1328_v12 = vor.u32 %v1700_v7, %v1327_v6  ;;  %v1687_v15 = vld [vmem:[#allocation4 + $0xc4] sm:$0xf]  ;;  %v84_v17 = vld [vmem:[%s2084_s0] sm:$0xff]  ;;  %v1184_v24 = vor.u32 %v1664_v9, %v1183_v5  ;;  %s1165_s12 = sshll.u32 %s2093_s9, 4  ;;  %s1166_s12 = int_to_ptr.hbm [resolvable:$true] %s1165_s12 }
  0x23   :  { %425 = vmatpush.bf16.msra.mxu0 %v1220_v46  ;;  %v1281_v16 = vld [vmem:[#allocation4 + $0xcc] sm:$0xf0]  ;;  %v1315_v19 = vld [vmem:[#allocation4 + $0x108] sm:$0xf]  ;;  %v1697_v20 = vld [vmem:[#allocation4 + $0x110] sm:$0xf0]  ;;  %v159_v27 = vunpack.c.l.b16 %v84_v17  ;;  %v1188_v29 = vor.u32 %v1663_v10, %v1185_v11  ;;  %v160_v33 = vunpack.c.h.b16 %v84_v17 }
  0x24   :  { %451 = vmatpush.bf16.msra.mxu2 %v1224_v48  ;;  %436 = vmatpush.bf16.msra.mxu1 %v1340_v1  ;;  %v1275_v18 = vld [vmem:[#allocation4 + $0xb0] sm:$0xf]  ;;  %v1686_v21 = vld [vmem:[#allocation4 + $0xb8] sm:$0xf0]  ;;  %v1459_v22 = vld [vmem:[#allocation7 + $0xa8] sm:$0xf]  ;;  %v1316_v28 = vor.u32 %v1697_v20, %v1315_v19  ;;  %v1284_v30 = vor.u32 %v1687_v15, %v1281_v16 }
  0x25   :  { %464 = vmatpush.bf16.msra.mxu3 %v1320_v49  ;;  %v1733_v23 = vld [vmem:[#allocation7 + $0xb0] sm:$0xf0]  ;;  %v1732_v25 = vld [vmem:[#allocation7 + $0xac] sm:$0xf]  ;;  %v1461_v26 = vld [vmem:[#allocation7 + $0xb4] sm:$0xf0]  ;;  %v1276_v34 = vor.u32 %v1686_v21, %v1275_v18  ;;  %v2001_v43 = vpack.c.b16 %v159_v27, %v159_v27  ;;  %v2003_v45 = vpack.c.b16 %v160_v33, %v160_v33 }
  0x26   :  { %v1303_v31 = vld [vmem:[#allocation4 + $0xf0] sm:$0xf]  ;;  %v1694_v32 = vld [vmem:[#allocation4 + $0xf8] sm:$0xf0]  ;;  %v1460_v35 = vor.u32 %v1733_v23, %v1459_v22  ;;  %v1263_v36 = vld [vmem:[#allocation4 + $0x98] sm:$0xf]  ;;  %v1464_v37 = vor.u32 %v1732_v25, %v1461_v26 }
  0x27   :  { %426 = vmatpush.bf16.msra.mxu0 %v1208_v57  ;;  %v1683_v38 = vld [vmem:[#allocation4 + $0xa0] sm:$0xf0]  ;;  %v1447_v39 = vld [vmem:[#allocation7 + $0x90] sm:$0xf]  ;;  %v1730_v40 = vld [vmem:[#allocation7 + $0x98] sm:$0xf0]  ;;  %v1304_v44 = vor.u32 %v1694_v32, %v1303_v31 }
  0x28   :  { %452 = vmatpush.bf16.msra.mxu2 %v1212_v60  ;;  %437 = vmatpush.bf16.msra.mxu1 %v1328_v12  ;;  %v1729_v41 = vld [vmem:[#allocation7 + $0x94] sm:$0xf]  ;;  %v1449_v42 = vld [vmem:[#allocation7 + $0x9c] sm:$0xf0]  ;;  %v1291_v46 = vld [vmem:[#allocation4 + $0xd8] sm:$0xf]  ;;  %v1264_v48 = vor.u32 %v1683_v38, %v1263_v36  ;;  %v1448_v49 = vor.u32 %v1730_v40, %v1447_v39 }
  0x29   :  { %465 = vmatpush.bf16.msra.mxu3 %v1308_v61  ;;  %v1691_v47 = vld [vmem:[#allocation4 + $0xe0] sm:$0xf0]  ;;  %v1251_v50 = vld [vmem:[#allocation4 + $0x80] sm:$0xf]  ;;  %v1452_v51 = vor.u32 %v1729_v41, %v1449_v42  ;;  %v1680_v52 = vld [vmem:[#allocation4 + $0x88] sm:$0xf0] }
  0x2a   :  { %v1435_v53 = vld [vmem:[#allocation7 + $0x78] sm:$0xf]  ;;  %v1727_v54 = vld [vmem:[#allocation7 + $0x80] sm:$0xf0]  ;;  %v1726_v55 = vld [vmem:[#allocation7 + $0x7c] sm:$0xf]  ;;  %v1292_v57 = vor.u32 %v1691_v47, %v1291_v46  ;;  %v1252_v60 = vor.u32 %v1680_v52, %v1251_v50 }
  0x2b   :  { %427 = vmatpush.bf16.msra.mxu0 %v1196_v8  ;;  %v1437_v56 = vld [vmem:[#allocation7 + $0x84] sm:$0xf0]  ;;  %v1279_v58 = vld [vmem:[#allocation4 + $0xc0] sm:$0xf]  ;;  %v1688_v59 = vld [vmem:[#allocation4 + $0xc8] sm:$0xf0]  ;;  %v1436_v61 = vor.u32 %v1727_v54, %v1435_v53 }
  0x2c   :  { %453 = vmatpush.bf16.msra.mxu2 %v1200_v13  ;;  %438 = vmatpush.bf16.msra.mxu1 %v1316_v28  ;;  %v1239_v62 = vld [vmem:[#allocation4 + $0x68] sm:$0xf]  ;;  %v1371_v63 = vld [vmem:[#allocation4 + $0x170] sm:$0xf]  ;;  %v1710_v0 = vld [vmem:[#allocation4 + $0x178] sm:$0xf0]  ;;  %v1440_v1 = vor.u32 %v1726_v55, %v1437_v56  ;;  %v1280_v7 = vor.u32 %v1688_v59, %v1279_v58 }
  0x2d   :  { %466 = vmatpush.bf16.msra.mxu3 %v1296_v14  ;;  %v1677_v2 = vld [vmem:[#allocation4 + $0x70] sm:$0xf0]  ;;  %v1423_v3 = vld [vmem:[#allocation7 + $0x60] sm:$0xf]  ;;  %v1724_v4 = vld [vmem:[#allocation7 + $0x68] sm:$0xf0]  ;;  %v1372_v8 = vor.u32 %v1710_v0, %v1371_v63 }
  0x2e   :  { %v1723_v5 = vld [vmem:[#allocation7 + $0x64] sm:$0xf]  ;;  %v1425_v6 = vld [vmem:[#allocation7 + $0x6c] sm:$0xf0]  ;;  %v1240_v9 = vor.u32 %v1677_v2, %v1239_v62  ;;  %v1424_v10 = vor.u32 %v1724_v4, %v1423_v3  ;;  %v1359_v12 = vld [vmem:[#allocation4 + $0x158] sm:$0xf] }
  0x2f   :  { %428 = vmatpush.bf16.msra.mxu0 %v1184_v24  ;;  %v1227_v11 = vld [vmem:[#allocation4 + $0x50] sm:$0xf]  ;;  %v1707_v13 = vld [vmem:[#allocation4 + $0x160] sm:$0xf0]  ;;  %v1428_v14 = vor.u32 %v1723_v5, %v1425_v6  ;;  %v1674_v15 = vld [vmem:[#allocation4 + $0x58] sm:$0xf0] }
  0x30   :  { %454 = vmatpush.bf16.msra.mxu2 %v1188_v29  ;;  %439 = vmatpush.bf16.msra.mxu1 %v1304_v44  ;;  %v1411_v16 = vld [vmem:[#allocation7 + $0x48] sm:$0xf]  ;;  %v1721_v17 = vld [vmem:[#allocation7 + $0x50] sm:$0xf0]  ;;  %v1720_v18 = vld [vmem:[#allocation7 + $0x4c] sm:$0xf]  ;;  %v1360_v20 = vor.u32 %v1707_v13, %v1359_v12  ;;  %v1228_v21 = vor.u32 %v1674_v15, %v1227_v11 }
  0x31   :  { %467 = vmatpush.bf16.msra.mxu3 %v1284_v30  ;;  %v1413_v19 = vld [vmem:[#allocation7 + $0x54] sm:$0xf0]  ;;  %v1412_v22 = vor.u32 %v1721_v17, %v1411_v16  ;;  %v1347_v24 = vld [vmem:[#allocation4 + $0x140] sm:$0xf]  ;;  %v1704_v25 = vld [vmem:[#allocation4 + $0x148] sm:$0xf0] }
  0x32   :  { %429 = vmatmul.bf16.vlgmr.msra.gmra.mxu0 %v2001_v43  ;;  %v1215_v23 = vld [vmem:[#allocation4 + $0x38] sm:$0xf]  ;;  %v1416_v26 = vor.u32 %v1720_v18, %v1413_v19  ;;  %v1671_v27 = vld [vmem:[#allocation4 + $0x40] sm:$0xf0]  ;;  %v1399_v28 = vld [vmem:[#allocation7 + $0x30] sm:$0xf]  ;;  %v1348_v32 = vor.u32 %v1704_v25, %v1347_v24 }
  0x33   :  { %473 = vmatpush.bf16.msrb.mxu0 %v1276_v34  ;;  %455 = vmatmul.bf16.vlgmr.msra.gmra.mxu2 %v2001_v43  ;;  %v1718_v29 = vld [vmem:[#allocation7 + $0x38] sm:$0xf0]  ;;  %v1717_v30 = vld [vmem:[#allocation7 + $0x34] sm:$0xf]  ;;  %v1401_v31 = vld [vmem:[#allocation7 + $0x3c] sm:$0xf0]  ;;  %v1216_v33 = vor.u32 %v1671_v27, %v1215_v23 }
  0x34   :  { %668 = vmatpush.bf16.msrb.mxu2 %v1460_v35  ;;  %468 = vmatmul.bf16.vlgmr.msra.gmra.mxu3 %v2003_v45  ;;  %v1400_v34 = vor.u32 %v1718_v29, %v1399_v28  ;;  %v1203_v35 = vld [vmem:[#allocation4 + $0x20] sm:$0xf]  ;;  %v1335_v36 = vld [vmem:[#allocation4 + $0x128] sm:$0xf]  ;;  %v1404_v38 = vor.u32 %v1717_v30, %v1401_v31  ;;  %v1668_v39 = vld [vmem:[#allocation4 + $0x28] sm:$0xf0] }
  0x35   :  { %681 = vmatpush.bf16.msrb.mxu3 %v1464_v37  ;;  %440 = vmatpush.bf16.msra.mxu1 %v1292_v57  ;;  %v1701_v37 = vld [vmem:[#allocation4 + $0x130] sm:$0xf0]  ;;  %v1387_v40 = vld [vmem:[#allocation7 + $0x18] sm:$0xf]  ;;  %v1715_v41 = vld [vmem:[#allocation7 + $0x20] sm:$0xf0] }
  0x36   :  { %v1714_v42 = vld [vmem:[#allocation7 + $0x1c] sm:$0xf]  ;;  %v1389_v44 = vld [vmem:[#allocation7 + $0x24] sm:$0xf0]  ;;  %v1336_v47 = vor.u32 %v1701_v37, %v1335_v36  ;;  %v1665_v50 = vld [vmem:[#allocation4 + $0x10] sm:$0xf0] }
  0x37   :  { %474 = vmatpush.bf16.msrb.mxu0 %v1264_v48  ;;  %v1191_v46 = vld [vmem:[#allocation4 + $0x8] sm:$0xf]  ;;  %v1204_v48 = vor.u32 %v1668_v39, %v1203_v35  ;;  %v1698_v52 = vld [vmem:[#allocation4 + $0x118] sm:$0xf0]  ;;  %v1392_v53 = vor.u32 %v1714_v42, %v1389_v44  ;;  %v1375_v54 = vld [vmem:[#allocation7] sm:$0xf] }
  0x38   :  { %669 = vmatpush.bf16.msrb.mxu2 %v1448_v49  ;;  %v1388_v49 = vor.u32 %v1715_v41, %v1387_v40  ;;  %v1712_v55 = vld [vmem:[#allocation7 + $0x8] sm:$0xf0]  ;;  %v1711_v56 = vld [vmem:[#allocation7 + $0x4] sm:$0xf]  ;;  %v1377_v57 = vld [vmem:[#allocation7 + $0xc] sm:$0xf0] }
  0x39   :  { %682 = vmatpush.bf16.msrb.mxu3 %v1452_v51  ;;  %441 = vmatpush.bf16.msra.mxu1 %v1280_v7  ;;  %v1323_v51 = vld [vmem:[#allocation4 + $0x110] sm:$0xf]  ;;  %v1734_v59 = vld [vmem:[#allocation7 + $0xb8] sm:$0xf0]  ;;  %v1376_v62 = vor.u32 %v1712_v55, %v1375_v54  ;;  %v1311_v0 = vld [vmem:[#allocation4 + $0xf8] sm:$0xf]  ;;  %v1380_v2 = vor.u32 %v1711_v56, %v1377_v57 }
  0x3a   :  { %v1467_v58 = vld [vmem:[#allocation7 + $0xb0] sm:$0xf]  ;;  %v2012_v63 = vld [vmem:[%s2085_s1] sm:$0xff]  ;;  %v1455_v4 = vld [vmem:[#allocation7 + $0x98] sm:$0xf]  ;;  %s1938_s9 = smov [#allocation10]  }
  0x3b   :  { %475 = vmatpush.bf16.msrb.mxu0 %v1252_v60  ;;  %v1324_v60 = vor.u32 %v1698_v52, %v1323_v51  ;;  %v1468_v3 = vor.u32 %v1734_v59, %v1467_v58  ;;  %v1731_v5 = vld [vmem:[#allocation7 + $0xa0] sm:$0xf0]  ;;  %v499_v6 = vpack.c.bf16 %v2012_v63, %v2012_v63  ;;  %v1443_v11 = vld [vmem:[#allocation7 + $0x80] sm:$0xf]  ;;  %v1728_v12 = vld [vmem:[#allocation7 + $0x88] sm:$0xf0] }
  0x3c   :  { %670 = vmatpush.bf16.msrb.mxu2 %v1436_v61  ;;  %442 = vmatmul.bf16.vlgmr.msra.gmra.mxu1 %v2003_v45  ;;  %v1192_v61 = vor.u32 %v1665_v50, %v1191_v46  ;;  %v1689_v15 = vld [vmem:[#allocation4 + $0xd0] sm:$0xf0]  ;;  %v1444_v16 = vor.u32 %v1728_v12, %v1443_v11  ;;  %v1431_v17 = vld [vmem:[#allocation7 + $0x68] sm:$0xf]  ;;  %v1407_v24 = vld [vmem:[#allocation7 + $0x38] sm:$0xf] }
  0x3d   :  { %683 = vmatpush.bf16.msrb.mxu3 %v1440_v1  ;;  %486 = vmatpush.bf16.msrb.mxu1 %v1372_v8  ;;  %v1695_v1 = vld [vmem:[#allocation4 + $0x100] sm:$0xf0]  ;;  %v1299_v8 = vld [vmem:[#allocation4 + $0xe0] sm:$0xf]  ;;  %v1725_v18 = vld [vmem:[#allocation7 + $0x70] sm:$0xf0] }
  0x3e   :  { %v1312_v7 = vor.u32 %v1695_v1, %v1311_v0  ;;  %v1719_v25 = vld [vmem:[#allocation7 + $0x40] sm:$0xf0]  ;;  %v1395_v27 = vld [vmem:[#allocation7 + $0x20] sm:$0xf]  ;;  %v1716_v28 = vld [vmem:[#allocation7 + $0x28] sm:$0xf0] }
  0x3f   :  { %476 = vmatpush.bf16.msrb.mxu0 %v1240_v9  ;;  %v1692_v9 = vld [vmem:[#allocation4 + $0xe8] sm:$0xf0]  ;;  %v1396_v29 = vor.u32 %v1716_v28, %v1395_v27  ;;  %v1383_v30 = vld [vmem:[#allocation7 + $0x8] sm:$0xf]  ;;  %v1713_v31 = vld [vmem:[#allocation7 + $0x10] sm:$0xf0] }
  0x40   :  { %671 = vmatpush.bf16.msrb.mxu2 %v1424_v10  ;;  %v1456_v10 = vor.u32 %v1731_v5, %v1455_v4  ;;  %v1300_v13 = vor.u32 %v1692_v9, %v1299_v8  ;;  %v1529_v40 = vld [vmem:[#allocation9 + $0x170] sm:$0xf]  ;;  %v1782_v41 = vld [vmem:[#allocation9 + $0x174] sm:$0xf0]  ;;  %v1781_v42 = vld [vmem:[#allocation9 + $0x174] sm:$0xf] }
  0x41   :  { %684 = vmatpush.bf16.msrb.mxu3 %v1428_v14  ;;  %487 = vmatpush.bf16.msrb.mxu1 %v1360_v20  ;;  %v1287_v14 = vld [vmem:[#allocation4 + $0xc8] sm:$0xf]  ;;  %v1432_v20 = vor.u32 %v1725_v18, %v1431_v17  ;;  %v1530_v44 = vor.u32 %v1782_v41, %v1529_v40  ;;  %v1531_v46 = vld [vmem:[#allocation9 + $0x178] sm:$0xf0]  ;;  %v1779_v51 = vld [vmem:[#allocation9 + $0x164] sm:$0xf] }
  0x42   :  { %v1288_v19 = vor.u32 %v1689_v15, %v1287_v14  ;;  %v1780_v50 = vld [vmem:[#allocation9 + $0x164] sm:$0xf0]  ;;  %v1593_v55 = vld [vmem:[#allocation9 + $0x70] sm:$0xf]  ;;  %v1750_v56 = vld [vmem:[#allocation9 + $0x74] sm:$0xf0] }
  0x43   :  { %477 = vmatpush.bf16.msrb.mxu0 %v1228_v21  ;;  %v1419_v21 = vld [vmem:[#allocation7 + $0x50] sm:$0xf]  ;;  %v1594_v57 = vor.u32 %v1750_v56, %v1593_v55  ;;  %v1778_v59 = vld [vmem:[#allocation9 + $0x154] sm:$0xf0]  ;;  %v2027_v0 = vld [vmem:[%s2088_s4] sm:$0x7] }
  0x44   :  { %672 = vmatpush.bf16.msrb.mxu2 %v1412_v22  ;;  %v1722_v22 = vld [vmem:[#allocation7 + $0x58] sm:$0xf0]  ;;  %v1513_v58 = vld [vmem:[#allocation9 + $0x150] sm:$0xf]  ;;  %v1748_v4 = vld [vmem:[#allocation9 + $0x64] sm:$0xf0] }
  0x45   :  { %685 = vmatpush.bf16.msrb.mxu3 %v1416_v26  ;;  %488 = vmatpush.bf16.msrb.mxu1 %v1348_v32  ;;  %v1420_v23 = vor.u32 %v1722_v22, %v1419_v21  ;;  %v1408_v26 = vor.u32 %v1719_v25, %v1407_v24  ;;  %v1384_v32 = vor.u32 %v1713_v31, %v1383_v30  ;;  %v1775_v8 = vld [vmem:[#allocation9 + $0x144] sm:$0xf]  ;;  %v2033_v9 = vld [vmem:[%s2089_s5] sm:$0x7]  ;;  %v1507_v11 = vld [vmem:[#allocation9 + $0x148] sm:$0xf0] }
  0x46   :  { %v153_v12 = vperm.slane %v2027_v0, 1  ;;  %v1746_v17 = vld [vmem:[#allocation9 + $0x54] sm:$0xf0]  ;;  %v1657_v18 = vld [vmem:[#allocation9 + $0xf0] sm:$0xf]  ;;  %v535_v28 = vperm.slane %v2033_v9, 1 }
  0x47   :  { %478 = vmatpush.bf16.msrb.mxu0 %v1216_v33  ;;  %v1766_v21 = vld [vmem:[#allocation9 + $0xf4] sm:$0xf0]  ;;  %v1497_v22 = vld [vmem:[#allocation9 + $0x130] sm:$0xf]  ;;  %v1773_v25 = vld [vmem:[#allocation9 + $0x134] sm:$0xf] }
  0x48   :  { %673 = vmatpush.bf16.msrb.mxu2 %v1400_v34  ;;  %v1774_v24 = vld [vmem:[#allocation9 + $0x134] sm:$0xf0]  ;;  %v1764_v40 = vld [vmem:[#allocation9 + $0xe4] sm:$0xf0]  ;;  %v1489_v41 = vld [vmem:[#allocation9 + $0x120] sm:$0xf] }
  0x49   :  { %686 = vmatpush.bf16.msrb.mxu3 %v1404_v38  ;;  %489 = vmatpush.bf16.msrb.mxu1 %v1336_v47  ;;  %v1534_v47 = vor.u32 %v1781_v42, %v1531_v46  ;;  %v1772_v42 = vld [vmem:[#allocation9 + $0x124] sm:$0xf0]  ;;  %v1742_v55 = vld [vmem:[#allocation9 + $0x34] sm:$0xf0]  ;;  %v1641_v56 = vld [vmem:[#allocation9 + $0xd0] sm:$0xf] }
  0x4a   :  { %s1937_s4 = smov [#allocation11]   ;;  %s1152_s15 = sshll.u32 %s1938_s9, 4  ;;  %s1153_s15 = int_to_ptr.vmem [resolvable:$true] %s1152_s15 }
  0x4b   :  { %479 = vmatpush.bf16.msrb.mxu0 %v1204_v48  ;;  %s1163_s5 = sshll.u32 %s1937_s4, 4  ;;  %s1154_s18 = sshll.u32 %s2092_s8, 4  ;;  %s1164_s5 = int_to_ptr.vmem [resolvable:$true] %s1163_s5  ;;  %s1155_s18 = int_to_ptr.hbm [resolvable:$true] %s1154_s18 }
  0x4c   :  { %674 = vmatpush.bf16.msrb.mxu2 %v1388_v49  ;;  %v1521_v49 = vld [vmem:[#allocation9 + $0x160] sm:$0xf] }
  0x4d   :  { %687 = vmatpush.bf16.msrb.mxu3 %v1392_v53  ;;  %490 = vmatpush.bf16.msrb.mxu1 %v1324_v60  ;;  %v1522_v52 = vor.u32 %v1780_v50, %v1521_v49  ;;  %v1523_v53 = vld [vmem:[#allocation9 + $0x168] sm:$0xf0]  ;;  %v1777_v60 = vld [vmem:[#allocation9 + $0x154] sm:$0xf] }
  0x4e   :  { %v1526_v54 = vor.u32 %v1779_v51, %v1523_v53  ;;  %v1491_v49 = vld [vmem:[#allocation9 + $0x128] sm:$0xf0] }
  0x4f   :  { %480 = vmatpush.bf16.msrb.mxu0 %v1192_v61  ;;  %v1514_v61 = vor.u32 %v1778_v59, %v1513_v58  ;;  %v1762_v59 = vld [vmem:[#allocation9 + $0xd4] sm:$0xf0] }
  0x50   :  { %675 = vmatpush.bf16.msrb.mxu2 %v1376_v62  ;;  %v1515_v62 = vld [vmem:[#allocation9 + $0x158] sm:$0xf0] }
  0x51   :  { %688 = vmatpush.bf16.msrb.mxu3 %v1380_v2  ;;  %491 = vmatpush.bf16.msrb.mxu1 %v1312_v7  ;;  %v1518_v1 = vor.u32 %v1777_v60, %v1515_v62  ;;  %v152_v2 = vperm.slane %v2027_v0, 0  ;;  %v1776_v7 = vld [vmem:[#allocation9 + $0x144] sm:$0xf0]  ;;  %v1481_v60 = vld [vmem:[#allocation9 + $0x110] sm:$0xf] }
  0x52   :  { %481 = vmatmul.bf16.vlgmr.msrb.gmra.mxu0 %v2001_v43 }
  0x53   :  { %694 = vmatpush.bf16.msra.mxu0 %v1468_v3  ;;  %676 = vmatmul.bf16.vlgmr.msrb.gmra.mxu2 %v499_v6  ;;  %v1585_v3 = vld [vmem:[#allocation9 + $0x60] sm:$0xf] }
  0x54   :  { %689 = vmatmul.bf16.vlgmr.msrb.gmra.mxu3 %v499_v6  ;;  %900 = vmatpush.bf16.msra.mxu2 %v1534_v47  ;;  %v1586_v5 = vor.u32 %v1748_v4, %v1585_v3  ;;  %v1490_v47 = vor.u32 %v1772_v42, %v1489_v41  ;;  %v1769_v3 = vld [vmem:[#allocation9 + $0x114] sm:$0xf]  ;;  %v1483_v4 = vld [vmem:[#allocation9 + $0x118] sm:$0xf0]  ;;  %v1587_v41 = vld [vmem:[#allocation9 + $0x68] sm:$0xf0] }
  0x55   :  { %492 = vmatpush.bf16.msrb.mxu1 %v1300_v13  ;;  %1080 = vmatpush.bf16.msra.mxu3 %v1594_v57  ;;  %v1510_v13 = vor.u32 %v1775_v8, %v1507_v11  ;;  %v1740_v8 = vld [vmem:[#allocation9 + $0x24] sm:$0xf0]  ;;  %v1763_v42 = vld [vmem:[#allocation9 + $0xe4] sm:$0xf] }
  0x57   :  { %695 = vmatpush.bf16.msra.mxu0 %v1456_v10 }
  0x58   :  { %901 = vmatpush.bf16.msra.mxu2 %v1526_v54  ;;  %v1561_v54 = vld [vmem:[#allocation9 + $0x30] sm:$0xf] }
  0x59   :  { %493 = vmatpush.bf16.msrb.mxu1 %v1288_v19  ;;  %1081 = vmatpush.bf16.msra.mxu3 %v1586_v5  ;;  %v534_v19 = vperm.slane %v2033_v9, 0  ;;  %v1562_v58 = vor.u32 %v1742_v55, %v1561_v54  ;;  %v1745_v55 = vld [vmem:[#allocation9 + $0x54] sm:$0xf] }
  0x5b   :  { %696 = vmatpush.bf16.msra.mxu0 %v1444_v16  ;;  %v1577_v16 = vld [vmem:[#allocation9 + $0x50] sm:$0xf] }
  0x5c   :  { %494 = vmatmul.bf16.vlgmr.msrb.gmra.mxu1 %v2003_v45  ;;  %902 = vmatpush.bf16.msra.mxu2 %v1518_v1 }
  0x5d   :  { %887 = vmatpush.bf16.msra.mxu1 %v1530_v44 }
  0x5f   :  { %697 = vmatpush.bf16.msra.mxu0 %v1432_v20  ;;  %v1578_v20 = vor.u32 %v1746_v17, %v1577_v16  ;;  %v1768_v16 = vld [vmem:[#allocation9 + $0x104] sm:$0xf0] }
  0x60   :  { %903 = vmatpush.bf16.msra.mxu2 %v1510_v13  ;;  %v1760_v13 = vld [vmem:[#allocation9 + $0xc4] sm:$0xf0] }
  0x61   :  { %888 = vmatpush.bf16.msra.mxu1 %v1522_v52  ;;  %1082 = vmatpush.bf16.msra.mxu3 %v1578_v20  ;;  %v1767_v20 = vld [vmem:[#allocation9 + $0x104] sm:$0xf] }
  0x63   :  { %698 = vmatpush.bf16.msra.mxu0 %v1420_v23  ;;  %v1658_v23 = vor.u32 %v1766_v21, %v1657_v18  ;;  %v1475_v21 = vld [vmem:[#allocation9 + $0x108] sm:$0xf0] }
  0x65   :  { %889 = vmatpush.bf16.msra.mxu1 %v1514_v61  ;;  %v1770_v61 = vld [vmem:[#allocation9 + $0x114] sm:$0xf0] }
  0x67   :  { %699 = vmatpush.bf16.msra.mxu0 %v1408_v26  ;;  %v1499_v26 = vld [vmem:[#allocation9 + $0x138] sm:$0xf0] }
  0x68   :  { %v1502_v30 = vor.u32 %v1773_v25, %v1499_v26  ;;  %v1765_v25 = vld [vmem:[#allocation9 + $0xf4] sm:$0xf]  ;;  %v1659_v26 = vld [vmem:[#allocation9 + $0xf8] sm:$0xf0] }
  0x6a   :  { %904 = vmatpush.bf16.msra.mxu2 %v1502_v30  ;;  %v1738_v30 = vld [vmem:[#allocation9 + $0x14] sm:$0xf0] }
  0x6b   :  { %700 = vmatpush.bf16.msra.mxu0 %v1396_v29  ;;  %v1498_v29 = vor.u32 %v1774_v24, %v1497_v22  ;;  %v1749_v22 = vld [vmem:[#allocation9 + $0x74] sm:$0xf]  ;;  %v1595_v24 = vld [vmem:[#allocation9 + $0x78] sm:$0xf0] }
  0x6f   :  { %701 = vmatpush.bf16.msra.mxu0 %v1384_v32  ;;  %v1569_v32 = vld [vmem:[#allocation9 + $0x40] sm:$0xf] }
  0x72   :  { %702 = vmatmul.bf16.vlgmr.msra.gmra.mxu0 %v499_v6  ;;  %v1505_v6 = vld [vmem:[#allocation9 + $0x140] sm:$0xf] }
  0x73   :  { %v1506_v10 = vor.u32 %v1776_v7, %v1505_v6  ;;  %1093 = vmatpush.bf16.msrb.mxu0 %v1658_v23  ;;  %v1486_v6 = vor.u32 %v1769_v3, %v1483_v4  ;;  %v1553_v7 = vld [vmem:[#allocation9 + $0x20] sm:$0xf]  ;;  %v1478_v23 = vor.u32 %v1767_v20, %v1475_v21  ;;  %v1571_v3 = vld [vmem:[#allocation9 + $0x48] sm:$0xf0]  ;;  %v1759_v4 = vld [vmem:[#allocation9 + $0xc4] sm:$0xf] }
  0x74   :  { %v536_v20 = vperm.slane %v2033_v9, 2 }
  0x75   :  { %890 = vmatpush.bf16.msra.mxu1 %v1506_v10  ;;  %v1633_v10 = vld [vmem:[#allocation9 + $0xc0] sm:$0xf] }
  0x76   :  { %v1634_v18 = vor.u32 %v1760_v13, %v1633_v10  ;;  %v1601_v10 = vld [vmem:[#allocation9 + $0x80] sm:$0xf] }
  0x79   :  { %891 = vmatpush.bf16.msra.mxu1 %v1498_v29  ;;  %v1545_v29 = vld [vmem:[#allocation9 + $0x10] sm:$0xf] }
  0x7d   :  { %892 = vmatpush.bf16.msra.mxu1 %v1490_v47  ;;  %v1651_v47 = vld [vmem:[#allocation9 + $0xe8] sm:$0xf0] }
  0xaf   :  { %v430_v33 = vpop.f32.mrf.mxu0 }
  0xb0   :  { %v431_v14 = vadd.f32 %v430_v33, %v152_v2  ;;  %v1744_v33 = vld [vmem:[#allocation9 + $0x44] sm:$0xf0]  ;;  %v1482_v2 = vor.u32 %v1770_v61, %v1481_v60  ;;  %v1609_v61 = vld [vmem:[#allocation9 + $0x90] sm:$0xf] }
  0xb2   :  { %893 = vmatpush.bf16.msra.mxu1 %v1482_v2 }
  0xb6   :  { %v2018_v34 = vpop.f32.mrf.mxu2 }
  0xb7   :  { %v2020_v35 = vpop.f32.mrf.mxu3  ;;  %v432_v36 = vpop.f32.mrf.mxu0  ;;  %v457_v27 = vadd.f32 %v2018_v34, %v153_v12  ;;  %v1554_v12 = vor.u32 %v1740_v8, %v1553_v7 }
  0xb8   :  { %v1649_v36 = vld [vmem:[#allocation9 + $0xe0] sm:$0xf] }
  0xb9   :  { %v2022_v37 = vpop.f32.mrf.mxu1  ;;  %v1650_v46 = vor.u32 %v1764_v40, %v1649_v36  ;;  %v470_v50 = vadd.f32 %v2020_v35, %v457_v27  ;;  %v1642_v35 = vor.u32 %v1762_v59, %v1641_v56  ;;  %v1598_v27 = vor.u32 %v1749_v22, %v1595_v24  ;;  %v1747_v40 = vld [vmem:[#allocation9 + $0x64] sm:$0xf]  ;;  %v1579_v56 = vld [vmem:[#allocation9 + $0x58] sm:$0xf0]  ;;  %v1741_v22 = vld [vmem:[#allocation9 + $0x34] sm:$0xf] }
  0xba   :  { %v444_v31 = vadd.f32 %v2022_v37, %v431_v14  ;;  %v1473_v14 = vld [vmem:[#allocation9 + $0x100] sm:$0xf]  ;;  %v1643_v59 = vld [vmem:[#allocation9 + $0xd8] sm:$0xf0] }
  0xbb   :  { %1094 = vmatpush.bf16.msrb.mxu0 %v1650_v46  ;;  %v1590_v46 = vor.u32 %v1747_v40, %v1587_v41 }
  0xbe   :  { %v458_v38 = vpop.f32.mrf.mxu2 }
  0xbf   :  { %v471_v39 = vpop.f32.mrf.mxu3  ;;  %1095 = vmatpush.bf16.msrb.mxu0 %v1642_v35  ;;  %v1743_v35 = vld [vmem:[#allocation9 + $0x44] sm:$0xf] }
  0xc0   :  { %v1570_v39 = vor.u32 %v1744_v33, %v1569_v32  ;;  %v1546_v32 = vor.u32 %v1738_v30, %v1545_v29  ;;  %v1758_v33 = vld [vmem:[#allocation9 + $0xb4] sm:$0xf0]  ;;  %v1574_v7 = vor.u32 %v1743_v35, %v1571_v3  ;;  %v1739_v30 = vld [vmem:[#allocation9 + $0x24] sm:$0xf] }
  0xc1   :  { %v445_v48 = vpop.f32.mrf.mxu1 }
  0xc2   :  { %v1771_v48 = vld [vmem:[#allocation9 + $0x124] sm:$0xf]  ;;  %1083 = vmatpush.bf16.msra.mxu3 %v1570_v39 }
  0xc3   :  { %v1494_v51 = vor.u32 %v1771_v48, %v1491_v49  ;;  %1096 = vmatpush.bf16.msrb.mxu0 %v1634_v18  ;;  %v1654_v49 = vor.u32 %v1763_v42, %v1651_v47 }
  0xc5   :  { %905 = vmatpush.bf16.msra.mxu2 %v1494_v51  ;;  %v1617_v51 = vld [vmem:[#allocation9 + $0xa0] sm:$0xf] }
  0xc6   :  { %1084 = vmatpush.bf16.msra.mxu3 %v1562_v58  ;;  %v1761_v58 = vld [vmem:[#allocation9 + $0xd4] sm:$0xf] }
  0xc7   :  { %v1646_v60 = vor.u32 %v1761_v58, %v1643_v59  ;;  %v1539_v58 = vld [vmem:[#allocation9 + $0x8] sm:$0xf0] }
  0xc9   :  { %906 = vmatpush.bf16.msra.mxu2 %v1486_v6 }
  0xca   :  { %1085 = vmatpush.bf16.msra.mxu3 %v1554_v12 }
  0xcd   :  { %907 = vmatpush.bf16.msra.mxu2 %v1478_v23  ;;  %v1563_v23 = vld [vmem:[#allocation9 + $0x38] sm:$0xf0] }
  0xce   :  { %1086 = vmatpush.bf16.msra.mxu3 %v1546_v32  ;;  %v1755_v32 = vld [vmem:[#allocation9 + $0xa4] sm:$0xf] }
  0xcf   :  { %v2036_v15 = vpop.f32.mrf.mxu0 }
  0xd6   :  { %v677_v38 = vpop.f32.mrf.mxu2 }
  0xd7   :  { %v678_v44 = vadd.f32 %v677_v38, %v534_v19  ;;  %v690_v34 = vpop.f32.mrf.mxu3  ;;  %v484_v53 = vpop.f32.mrf.mxu0  ;;  %v1474_v19 = vor.u32 %v1768_v16, %v1473_v14 }
  0xd8   :  { %v691_v37 = vadd.f32 %v690_v34, %v535_v28  ;;  %v1662_v28 = vor.u32 %v1765_v25, %v1659_v26  ;;  %v1566_v26 = vor.u32 %v1741_v22, %v1563_v23 }
  0xd9   :  { %v707_v52 = vadd.f32 %v678_v44, %v444_v31  ;;  %v2043_v1 = vpop.f32.mrf.mxu1  ;;  %v1625_v31 = vld [vmem:[#allocation9 + $0xb0] sm:$0xf]  ;;  %894 = vmatpush.bf16.msra.mxu1 %v1474_v19 }
  0xda   :  { %v708_v57 = vadd.f32 %v691_v37, %v470_v50  ;;  %1119 = vmatpush.bf16.msrb.mxu2 %v1662_v28  ;;  %v1626_v39 = vor.u32 %v1758_v33, %v1625_v31  ;;  %v1537_v50 = vld [vmem:[#allocation9] sm:$0xf]  ;;  %v1736_v37 = vld [vmem:[#allocation9 + $0x4] sm:$0xf0]  ;;  %v1627_v28 = vld [vmem:[#allocation9 + $0xb8] sm:$0xf0] }
  0xdb   :  { %v1469_v62 = vmul.f32 -1.442695, %v707_v52  ;;  %v1756_v52 = vld [vmem:[#allocation9 + $0xa4] sm:$0xf0]  ;;  %v1538_v53 = vor.u32 %v1736_v37, %v1537_v50  ;;  %v1555_v31 = vld [vmem:[#allocation9 + $0x28] sm:$0xf0] }
  0xdc   :  { %v1470_v5 = vmul.f32 -1.442695, %v708_v57  ;;  %1097 = vmatpush.bf16.msrb.mxu0 %v1626_v39  ;;  %v1618_v54 = vor.u32 %v1756_v52, %v1617_v51  ;;  %v1582_v57 = vor.u32 %v1745_v55, %v1579_v56  ;;  %v1558_v40 = vor.u32 %v1739_v30, %v1555_v31  ;;  %v1611_v50 = vld [vmem:[#allocation9 + $0x98] sm:$0xf0] }
  0xdd   :  { %1792 = vpow2.f32 %v1469_v62  ;;  %1106 = vmatpush.bf16.msrb.mxu1 %v1598_v27  ;;  %1087 = vmatpush.bf16.msra.mxu3 %v1538_v53  ;;  %v1754_v62 = vld [vmem:[#allocation9 + $0x94] sm:$0xf0]  ;;  %v1757_v27 = vld [vmem:[#allocation9 + $0xb4] sm:$0xf] }
  0xde   :  { %1794 = vpow2.f32 %v1470_v5  ;;  %v679_v11 = vpop.f32.mrf.mxu2  ;;  %1120 = vmatpush.bf16.msrb.mxu2 %v1654_v49  ;;  %v1610_v2 = vor.u32 %v1754_v62, %v1609_v61  ;;  %v1635_v5 = vld [vmem:[#allocation9 + $0xc8] sm:$0xf0] }
  0xdf   :  { %v692_v17 = vpop.f32.mrf.mxu3  ;;  %v1638_v8 = vor.u32 %v1759_v4, %v1635_v5  ;;  %v1752_v11 = vld [vmem:[#allocation9 + $0x84] sm:$0xf0]  ;;  %v1603_v61 = vld [vmem:[#allocation9 + $0x88] sm:$0xf0] }
  0xe0   :  { %1098 = vmatpush.bf16.msrb.mxu0 %v1618_v54  ;;  %1088 = vmatmul.bf16.vlgmr.msra.gmra.mxu3 %v2001_v43  ;;  %v154_v17 = vperm.slane %v2027_v0, 2  ;;  %v1602_v19 = vor.u32 %v1752_v11, %v1601_v10  ;;  %v1630_v0 = vor.u32 %v1757_v27, %v1627_v28 }
  0xe1   :  { %v497_v38 = vpop.f32.mrf.mxu1  ;;  %1107 = vmatpush.bf16.msrb.mxu1 %v1590_v46  ;;  %v1547_v46 = vld [vmem:[#allocation9 + $0x18] sm:$0xf0] }
  0xe2   :  { %1121 = vmatpush.bf16.msrb.mxu2 %v1646_v60  ;;  %v483_v9 = vadd.f32 %v2036_v15, %v154_v17  ;;  %v1753_v15 = vld [vmem:[#allocation9 + $0x94] sm:$0xf]  ;;  %v1751_v60 = vld [vmem:[#allocation9 + $0x84] sm:$0xf] }
  0xe3   :  { %v1793_v36 = vpop.eup %1792  ;;  %v1614_v56 = vor.u32 %v1753_v15, %v1611_v50 }
  0xe4   :  { %v1795_v44 = vpop.eup %1794  ;;  %v2045_v34 = vadd.f32 1.0, %v1793_v36  ;;  %1099 = vmatpush.bf16.msrb.mxu0 %v1610_v2  ;;  %v1619_v36 = vld [vmem:[#allocation9 + $0xa8] sm:$0xf0]  ;;  %v496_v52 = vadd.f32 %v2043_v1, %v483_v9  ;;  %v1606_v2 = vor.u32 %v1751_v60, %v1603_v61 }
  0xe5   :  { %v2047_v48 = vadd.f32 1.0, %v1795_v44  ;;  %1108 = vmatpush.bf16.msrb.mxu1 %v1582_v57  ;;  %v1622_v42 = vor.u32 %v1755_v32, %v1619_v36  ;;  %v1737_v44 = vld [vmem:[#allocation9 + $0x14] sm:$0xf]  ;;  %v1735_v57 = vld [vmem:[#allocation9 + $0x4] sm:$0xf] }
  0xe6   :  { %1796 = vrcp.f32 %v2045_v34  ;;  %v726_v18 = vand.u32 2147483647, %v2045_v34  ;;  %v728_v25 = vand.u32 2147483648, %v2045_v34  ;;  %1122 = vmatpush.bf16.msrb.mxu2 %v1638_v8  ;;  %vm722_vm1 = vweird.f32 %v2045_v34 }
  0xe7   :  { %1798 = vrcp.f32 %v2047_v48  ;;  %v743_v51 = vand.u32 2147483648, %v2047_v48  ;;  %v1550_v54 = vor.u32 %v1737_v44, %v1547_v46  ;;  %vm737_vm5 = vweird.f32 %v2047_v48 }
  0xe8   :  { %1100 = vmatpush.bf16.msrb.mxu0 %v1602_v19  ;;  %v729_v41 = vor.u32 1.1754944e-38, %v728_v25  ;;  %vm727_vm3 = vcmp.eq.f32.partialorder %v726_v18, 8.507059e+37  ;;  %v741_v55 = vand.u32 2147483647, %v2047_v48  ;;  %v1542_v1 = vor.u32 %v1735_v57, %v1539_v58 }
  0xe9   :  { %1109 = vmatpush.bf16.msrb.mxu1 %v1574_v7  ;;  %v744_v35 = vor.u32 1.1754944e-38, %v743_v51 }
  0xea   :  { %1123 = vmatpush.bf16.msrb.mxu2 %v1630_v0  ;;  %vm742_vm7 = vcmp.eq.f32.partialorder %v741_v55, 8.507059e+37 }
  0xeb   :  { %1101 = vmatmul.bf16.vlgmr.msrb.gmra.mxu0 %v2003_v45 }
  0xec   :  { %v1797_v6 = vpop.eup %1796 }
  0xed   :  { %v2051_v12 = vpop.eup %1798  ;;  %v718_v14 = vmul.f32 %v1797_v6, %v2045_v34  ;;  %vm723_vm0 = vweird.f32 %v1797_v6  ;;  %1110 = vmatpush.bf16.msrb.mxu1 %v1566_v26 }
  0xee   :  { %v733_v16 = vmul.f32 %v2051_v12, %v2047_v48  ;;  %vm724_vm2 = vmor %vm722_vm1, %vm723_vm0  ;;  %vm738_vm4 = vweird.f32 %v2051_v12  ;;  %1124 = vmatpush.bf16.msrb.mxu2 %v1622_v42 }
  0xef   :  { %v703_v13 = vpop.f32.mrf.mxu0  ;;  %v719_v21 = vsub.f32 1.0, %v718_v14  ;;  %vm739_vm6 = vmor %vm737_vm5, %vm738_vm4  ;;  %v1132_v14 = vld [vmem:[%s2091_s7] sm:$0x3] }
  0xf0   :  { %v734_v24 = vsub.f32 1.0, %v733_v16  ;;  %v704_v38 = vadd.f32 %v703_v13, %v536_v20 }
  0xf1   :  { %v720_v29 = vmul.f32 %v1797_v6, %v719_v21  ;;  %1111 = vmatpush.bf16.msrb.mxu1 %v1558_v40 }
  0xf2   :  { %v735_v33 = vmul.f32 %v2051_v12, %v734_v24  ;;  %1125 = vmatpush.bf16.msrb.mxu2 %v1614_v56  ;;  %v1135_v24 = vperm.slane %v1132_v14, 1 }
  0xf3   :  { %v721_v39 = vadd.f32 %v1797_v6, %v720_v29 }
  0xf4   :  { %v736_v34 = vadd.f32 %v2051_v12, %v735_v33 }
  0xf5   :  { %v725_v47 = vsel %vm724_vm2, %v1797_v6, %v721_v39  ;;  %1112 = vmatpush.bf16.msrb.mxu1 %v1550_v54 }
  0xf6   :  { %v730_v37 = vsel %vm727_vm3, %v729_v41, %v725_v47  ;;  %v740_v62 = vsel %vm739_vm6, %v2051_v12, %v736_v34  ;;  %1126 = vmatpush.bf16.msrb.mxu2 %v1606_v2 }
  0xf7   :  { %v705_v49 = vpop.f32.mrf.mxu0  ;;  %v747_v53 = vmul.f32 %v730_v37, %v704_v38  ;;  %v745_v3 = vsel %vm742_vm7, %v744_v35, %v740_v62 }
  0xf8   :  { %v750_v48 = vsub.f32 1.0, %v745_v3  ;;  %v752_v6 = vmul.f32 %v745_v3, %v2012_v63 }
  0xf9   :  { %v748_v59 = vadd.f32 %v747_v53, %v496_v52  ;;  %1113 = vmatpush.bf16.msrb.mxu1 %v1542_v1 }
  0xfb   :  { %1800 = vtanh.f32 %v748_v59 }
 0x101   :  { %v1801_v4 = vpop.eup %1800 }
 0x102   :  { %v751_v5 = vmul.f32 %v1801_v4, %v750_v48 }
 0x104   :  { %v753_v7 = vadd.f32 %v752_v6, %v751_v5 }
 0x106   :  { %v755_v8 = vpack.c.bf16 %v753_v7, %v753_v7  ;;  %1146 = vst [vmem:[#allocation11] sm:$0xff] %v753_v7 }
 0x107   :  { %1168 = dma.vmem_to_hbm [thread:$0]  %s1164_s5, 128, %s1166_s12, [#allocation12]  }
 0x108   :  { %756 = vst [vmem:[#allocation3] sm:$0xf] %v755_v8 }
 0x10f   :  { %v790_v10 = vld [vmem:[#allocation3] sm:$0xf] }
 0x110   :  { %895 = vmatmul.bf16.vlgmr.msra.gmra.mxu1 %v790_v10  ;;  %908 = vmatmul.bf16.vlgmr.msra.gmra.mxu2 %v790_v10 }
 0x120   :  { %1114 = vmatmul.bf16.vlgmr.msrb.gmra.mxu1 %v2001_v43  ;;  %1127 = vmatmul.bf16.vlgmr.msrb.gmra.mxu2 %v2003_v45  ;;  %v1134_v45 = vperm.slane %v1132_v14, 0 }
 0x163   :  { %v1089_v63 = vpop.f32.mrf.mxu3 }
 0x168   :  { %v1102_v11 = vpop.f32.mrf.mxu0 }
 0x16b   :  { %v1091_v12 = vpop.f32.mrf.mxu3 }
 0x170   :  { %v1104_v13 = vpop.f32.mrf.mxu0 }
 0x18d   :  { %v896_v43 = vpop.f32.mrf.mxu1 }
 0x18e   :  { %v1090_v16 = vadd.f32 %v1089_v63, %v896_v43 }
 0x190   :  { %v1103_v17 = vadd.f32 %v1102_v11, %v1090_v16 }
 0x192   :  { %v1138_v18 = vadd.f32 %v1134_v45, %v1103_v17 }
 0x193   :  { %v909_v19 = vpop.f32.mrf.mxu2 }
 0x194   :  { %1140 = vst [vmem:[#allocation10] sm:$0xff] %v1138_v18 }
 0x195   :  { %v898_v20 = vpop.f32.mrf.mxu1 }
 0x19b   :  { %v911_v21 = vpop.f32.mrf.mxu2 }
 0x19d   :  { %v1115_v22 = vpop.f32.mrf.mxu1 }
 0x19e   :  { %v1116_v23 = vadd.f32 %v1115_v22, %v909_v19 }
 0x1a3   :  { %v1128_v25 = vpop.f32.mrf.mxu2 }
 0x1a4   :  { %v1129_v26 = vadd.f32 %v1128_v25, %v1116_v23 }
 0x1a5   :  { %v1117_v27 = vpop.f32.mrf.mxu1 }
 0x1a6   :  { %v1139_v28 = vadd.f32 %v1135_v24, %v1129_v26 }
 0x1a8   :  { %1141 = vst [vmem:[#allocation10 + $0x8] sm:$0xff] %v1139_v28 }
 0x1a9   :  { %1157 = dma.vmem_to_hbm [thread:$0]  %s1153_s15, 256, %s1155_s18, [#allocation6]  }
 0x1ab   :  { %v1130_v29 = vpop.f32.mrf.mxu2 }
 0x1ac   :  { %1926 = dma.done.wait [#allocation6], 256  }
 0x1ad   :  { %1927 = vsyncadd [#allocation6], 4294967040 }
 0x1ae   :  { %1928 = dma.done.wait [#allocation12], 128  }
 0x1af   :  { %1929 = vsyncadd [#allocation12], 4294967168 }
 0x1b0   :  { %1177 = vsyncpa [#allocation5], 1 }
 0x1b1   :  { %1178 = vsyncpa [#allocation8], 1 }
 0x1b2   :  { %1179 = vsyncpa [#allocation6], 1 }
 0x1b3   :  { %1180 = vsyncpa [#allocation12], 1 }

</bundles_post_ra>
